<compile_context>
chip_gen: v7x
topology: tpu7x:2x2x1
jax: 0.10.0
libtpu: 0.0.40
codegen_flags: <defaults>
</compile_context>

<pallas_src>
import jax
import jax.numpy as jnp
from jax.experimental import pallas as pl
from jax.experimental.pallas import tpu as pltpu


def _make_copy_kernel(chunk_bounds):
    """Kernel factory: issue one HBM->HBM DMA per static (offset, size) chunk
    along the leading axis, all started before any wait (K in-flight DMAs)."""

    def kernel(x_hbm, o_hbm, sems):
        copies = []
        for i, (off, sz) in enumerate(chunk_bounds):
            cp = pltpu.make_async_copy(
                x_hbm.at[pl.ds(off, sz)],
                o_hbm.at[pl.ds(off, sz)],
                sems.at[i],
            )
            cp.start()
            copies.append(cp)
        for cp in copies:
            cp.wait()

    return kernel


def _device_copy(x, num_chunks=None):
    """HBM->HBM copy of `x` (native shape, no reshape) via a Pallas kernel."""
    lead = x.shape[0]
    bytes_total = x.size * x.dtype.itemsize

    if num_chunks is None:
        # Tiny volumes: a single descriptor already hits roofline.  Larger
        # volumes: a few concurrent descriptors hide per-DMA issue/ramp
        # latency on v6e/v7x.
        if bytes_total < (1 << 20) or lead < 2:
            num_chunks = 1
        else:
            num_chunks = min(4, lead)
    num_chunks = max(1, min(num_chunks, lead))

    # Static, even-as-possible chunking of the leading axis.
    base, rem = divmod(lead, num_chunks)
    bounds = []
    off = 0
    for i in range(num_chunks):
        sz = base + (1 if i < rem else 0)
        bounds.append((off, sz))
        off += sz

    return pl.pallas_call(
        _make_copy_kernel(bounds),
        out_shape=jax.ShapeDtypeStruct(x.shape, x.dtype),
        in_specs=[pl.BlockSpec(memory_space=pl.ANY)],
        out_specs=pl.BlockSpec(memory_space=pl.ANY),
        scratch_shapes=[pltpu.SemaphoreType.DMA((num_chunks,))],
        cost_estimate=pl.CostEstimate(
            flops=0, transcendentals=0, bytes_accessed=2 * bytes_total
        ),
    )(x)


def sitk_image_to_tensor(x, add_channels_dim=True, copy=True, num_chunks=None):
    """Pallas equivalent of SITKImageToTensor.forward.

    x: jnp array of shape (D, H, W) — the dense voxel array that
       sitk.GetArrayFromImage would have produced (SITK (z, y, x) order).
    copy: keep torch.tensor's defensive buffer copy (device DMA).  If the
       caller does not require a physically distinct buffer, copy=False skips
       the kernel entirely (0 HBM bytes).
    Returns (1, D, H, W) if add_channels_dim else (D, H, W).
    """
    out = _device_copy(x, num_chunks=num_chunks) if copy else x
    if add_channels_dim:
        # Metadata-only unsqueeze; zero HBM traffic.
        out = jnp.expand_dims(out, axis=0)
    return out


if __name__ == "__main__":
    # TODO(synk): sitk.GetArrayFromImage (host-side SITK image -> ndarray) has
    # no device/Pallas equivalent; we start from the equivalent dense array.
    key = jax.random.PRNGKey(0)

    # Small aligned volume.
    D, H, W = 4, 16, 128
    x = jax.random.normal(key, (D, H, W), dtype=jnp.float32)

    y = jax.block_until_ready(sitk_image_to_tensor(x, add_channels_dim=True))
    assert y.shape == (1, D, H, W), y.shape
    assert y.dtype == x.dtype
    assert bool(jnp.all(y[0] == x))

    y2 = jax.block_until_ready(sitk_image_to_tensor(x, add_channels_dim=False))
    assert y2.shape == (D, H, W), y2.shape
    assert bool(jnp.all(y2 == x))

    # Exercise the multi-descriptor (chunked DMA) path explicitly.
    y3 = jax.block_until_ready(
        sitk_image_to_tensor(x, add_channels_dim=True, num_chunks=2)
    )
    assert y3.shape == (1, D, H, W), y3.shape
    assert bool(jnp.all(y3[0] == x))

    # Unaligned spatial dims (H not multiple of 8, W not multiple of 128):
    # native-shape DMA, no hidden relayout copies.
    Do, Ho, Wo = 3, 10, 20
    xo = jax.random.normal(jax.random.PRNGKey(1), (Do, Ho, Wo), dtype=jnp.float32)
    yo = jax.block_until_ready(sitk_image_to_tensor(xo, add_channels_dim=True))
    assert yo.shape == (1, Do, Ho, Wo), yo.shape
    assert bool(jnp.all(yo[0] == xo))

    # copy=False fast path (metadata-only).
    yf = jax.block_until_ready(
        sitk_image_to_tensor(x, add_channels_dim=True, copy=False)
    )
    assert yf.shape == (1, D, H, W), yf.shape
    assert bool(jnp.all(yf[0] == x))

    print("KERNEL_OK")
</pallas_src>

<mosaic_0001>
module attributes {stable_mosaic.version = 11 : i64} {
  func.func @kernel(%arg0: memref<4x16x128xf32, #tpu.memory_space<any>>, %arg1: memref<4x16x128xf32, #tpu.memory_space<any>>, %arg2: memref<1x!tpu.dma_semaphore, #tpu.memory_space<semaphore_mem>>) attributes {dimension_semantics = [], scalar_prefetch = 0 : i64, scratch_operands = 1 : i64, tpu.core_type = #tpu.core_type<tc>} {
    %c0_i32 = arith.constant 0 : i32
    %c0_i32_0 = arith.constant 0 : i32
    %c0_i32_1 = arith.constant 0 : i32
    %c0_i32_2 = arith.constant 0 : i32
    %0 = tpu.memref_slice %arg0[%c0_i32_0, %c0_i32_1, %c0_i32_2] : memref<4x16x128xf32, #tpu.memory_space<any>> -> memref<4x16x128xf32, #tpu.memory_space<any>>
    %c0_i32_3 = arith.constant 0 : i32
    %c0_i32_4 = arith.constant 0 : i32
    %c0_i32_5 = arith.constant 0 : i32
    %1 = tpu.memref_slice %arg1[%c0_i32_3, %c0_i32_4, %c0_i32_5] : memref<4x16x128xf32, #tpu.memory_space<any>> -> memref<4x16x128xf32, #tpu.memory_space<any>>
    %2 = tpu.memref_slice %arg2[%c0_i32] : memref<1x!tpu.dma_semaphore, #tpu.memory_space<semaphore_mem>> -> memref<1x!tpu.dma_semaphore, #tpu.memory_space<semaphore_mem>>
    %3 = tpu.memref_squeeze %2 : memref<1x!tpu.dma_semaphore, #tpu.memory_space<semaphore_mem>> -> memref<!tpu.dma_semaphore, #tpu.memory_space<semaphore_mem>>
    tpu.enqueue_dma source(%0 : memref<4x16x128xf32, #tpu.memory_space<any>>) target(%1 : memref<4x16x128xf32, #tpu.memory_space<any>>) target_semaphore(%3 : memref<!tpu.dma_semaphore, #tpu.memory_space<semaphore_mem>>)
    %c0_i32_6 = arith.constant 0 : i32
    %c0_i32_7 = arith.constant 0 : i32
    %c0_i32_8 = arith.constant 0 : i32
    %c0_i32_9 = arith.constant 0 : i32
    %4 = tpu.memref_slice %arg0[%c0_i32_7, %c0_i32_8, %c0_i32_9] : memref<4x16x128xf32, #tpu.memory_space<any>> -> memref<4x16x128xf32, #tpu.memory_space<any>>
    %c0_i32_10 = arith.constant 0 : i32
    %c0_i32_11 = arith.constant 0 : i32
    %c0_i32_12 = arith.constant 0 : i32
    %5 = tpu.memref_slice %arg1[%c0_i32_10, %c0_i32_11, %c0_i32_12] : memref<4x16x128xf32, #tpu.memory_space<any>> -> memref<4x16x128xf32, #tpu.memory_space<any>>
    %6 = tpu.memref_slice %arg2[%c0_i32_6] : memref<1x!tpu.dma_semaphore, #tpu.memory_space<semaphore_mem>> -> memref<1x!tpu.dma_semaphore, #tpu.memory_space<semaphore_mem>>
    %7 = tpu.memref_squeeze %6 : memref<1x!tpu.dma_semaphore, #tpu.memory_space<semaphore_mem>> -> memref<!tpu.dma_semaphore, #tpu.memory_space<semaphore_mem>>
    tpu.wait_dma2 semaphore(%7 : memref<!tpu.dma_semaphore, #tpu.memory_space<semaphore_mem>>) src(%4 : memref<4x16x128xf32, #tpu.memory_space<any>>) dst(%5 : memref<4x16x128xf32, #tpu.memory_space<any>>)
    return
  }
}

</mosaic_0001>

<bundles_post_ra>
// kernel: tpu_custom_call.1
= control target key start
LH: loop header
LB: loop body
LE: loop exit
PB: predicated region body
PF: predicated region fallthrough
CT: control target
= control target key end

     0   :  { %s35_s6 = smov [#allocation2]   ;;  %s36_s7 = smov [#allocation3]   ;;  %s54_s0 = inlined_call_operand.hbm [shape: f32[4,16,128], index: 0, kind: input, shape index: {}]   ;;  %s55_s1 = inlined_call_operand.hbm [shape: f32[4,16,128], index: 1, kind: output, shape index: {}]  }
   0x1   :  { %s37_s8 = smov 0  }
   0x2   :  { %18 = dma.general %s54_s0, 1024, %s55_s1, %s35_s6, %s36_s7, [#allocation4], %s37_s8, 0  }
   0x3   :  { %33 = dma.done.wait [#allocation2], 1024 }
   0x4   :  { %34 = vsyncadd [#allocation2], 4294966272 }
   0x5   :  { %23 = vsyncmov [#allocation2] }
   0x8   :  { %s24_s13 = vpop.sfrf %23 }
   0x9   :  { %p29_p0 = scmp.ne.s32.totalorder %s24_s13, 0 }
   0xb   :  { %28 = shalt.err (%p29_p0)  }

</bundles_post_ra>
